<compile_context>
chip_gen: v5e
topology: v5e:2x2
jax: 0.10.0
libtpu: 0.0.40
codegen_flags: <defaults>
</compile_context>

<pallas_src>
import jax
import jax.numpy as jnp
from jax.experimental import pallas as pl
from jax.experimental.pallas import tpu as pltpu

LANE = 128


def _round_up(n, m):
    return ((n + m - 1) // m) * m


def _autoencoder_kernel(x_ref,
                        w1_ref, b1_ref,
                        w2_ref, b2_ref,
                        w3_ref, b3_ref,
                        w4_ref, b4_ref,
                        out_ref):
    """Encoder/decoder MLP chain for one (bt, F) tile, all in VMEM.

    x arrives f32 and is cast to bf16 in-kernel; matmuls run bf16 on the MXU
    with f32 accumulation; bias add + ReLU stay f32 (portable to v5e), with a
    single bf16 downcast feeding the next matmul.
    """
    def layer(h_bf16, w_ref, b_ref, relu):
        h = jnp.dot(h_bf16, w_ref[...], preferred_element_type=jnp.float32)
        h = h + b_ref[...]
        if relu:
            h = jnp.maximum(h, 0.0)
        return h

    x = x_ref[...].astype(jnp.bfloat16)                         # fused cast
    h1 = layer(x, w1_ref, b1_ref, True)                         # encoder L1
    h2 = layer(h1.astype(jnp.bfloat16), w2_ref, b2_ref, True)   # encoder L2
    h3 = layer(h2.astype(jnp.bfloat16), w3_ref, b3_ref, True)   # decoder L1
    y = layer(h3.astype(jnp.bfloat16), w4_ref, b4_ref, False)   # decoder L2

    out_ref[...] = y.astype(out_ref.dtype)


def prepare_params(params):
    """Pad/cast weights & biases ONCE (hidden dims lane-padded, F left alone)."""
    (w1, b1), (w2, b2), (w3, b3), (w4, b4) = params
    F = w1.shape[0]
    H = w1.shape[1]
    H2 = w2.shape[1]
    Hp = _round_up(H, LANE)
    H2p = _round_up(H2, LANE)

    def pad_w(w, rp, cp):
        r, c = w.shape
        return jnp.pad(w, ((0, rp - r), (0, cp - c))).astype(jnp.bfloat16)

    def pad_b(b, cp):
        b = b.reshape(1, -1)
        return jnp.pad(b, ((0, 0), (0, cp - b.shape[1]))).astype(jnp.float32)

    return dict(
        F=F, Hp=Hp, H2p=H2p,
        w1=pad_w(w1, F, Hp),   b1=pad_b(b1, Hp),     # K = F (unpadded)
        w2=pad_w(w2, Hp, H2p), b2=pad_b(b2, H2p),
        w3=pad_w(w3, H2p, Hp), b3=pad_b(b3, Hp),
        w4=pad_w(w4, Hp, F),   b4=pad_b(b4, F),      # N = F (unpadded output)
    )


def _vmem_max_bt(F, Hp, H2p, budget_bytes):
    """Largest batch tile (multiple of 8) whose working set fits budget_bytes."""
    # per-row bytes: double-buffered f32 x + f32 out blocks
    row = 2 * F * 4 + 2 * F * 4
    # f32 intermediates (h1, h3: Hp; h2: H2p) + their bf16 copies
    row += 4 * (2 * Hp + H2p) + 2 * (2 * Hp + H2p)
    # static: bf16 weights + f32 biases, default-double-buffered
    static = 2 * 2 * (F * Hp + Hp * H2p + H2p * Hp + Hp * F)
    static += 2 * 4 * (2 * Hp + H2p + F)
    avail = max(0, budget_bytes - static)
    return max(8, (avail // max(1, row)) // 8 * 8)


def autoencoder_forward(x, prepped, *, batch_tile=512):
    """x: (B, 1, input_size) float32 -> (B, 1, input_size) float32."""
    B = x.shape[0]
    F = x.shape[-1]
    assert F == prepped["F"], "input_size mismatch with prepared params"
    Hp, H2p = prepped["Hp"], prepped["H2p"]

    # Batch padded only to a multiple of the (small) tile; >=2 grid steps for
    # B8 >= 16 so v7x's two TensorCores both get work. VMEM clamp keeps the
    # working set under ~40 MiB (safe on v7x's 64 MiB VMEM).
    B8 = _round_up(B, 8)
    bt_cap = max(8, min(_round_up(batch_tile, 8),
                        _vmem_max_bt(F, Hp, H2p, 40 * 1024 * 1024)))
    n_tiles = 1 if B8 < 16 else max(2, pl.cdiv(B8, bt_cap))
    bt = _round_up(pl.cdiv(B8, n_tiles), 8)
    B_pad = n_tiles * bt

    x2d = x.reshape(B, F)                     # squeeze(1)
    if B_pad != B:
        x2d = jnp.pad(x2d, ((0, B_pad - B), (0, 0)))

    def full_spec(arr):
        nd = arr.ndim
        return pl.BlockSpec(arr.shape, lambda i, _n=nd: (0,) * _n)

    out = pl.pallas_call(
        _autoencoder_kernel,
        out_shape=jax.ShapeDtypeStruct((B_pad, F), x.dtype),
        grid_spec=pltpu.PrefetchScalarGridSpec(
            num_scalar_prefetch=0,
            grid=(n_tiles,),
            in_specs=[
                pl.BlockSpec((bt, F), lambda i: (i, 0)),
                full_spec(prepped["w1"]), full_spec(prepped["b1"]),
                full_spec(prepped["w2"]), full_spec(prepped["b2"]),
                full_spec(prepped["w3"]), full_spec(prepped["b3"]),
                full_spec(prepped["w4"]), full_spec(prepped["b4"]),
            ],
            out_specs=pl.BlockSpec((bt, F), lambda i: (i, 0)),
        ),
        compiler_params=pltpu.CompilerParams(
            dimension_semantics=("parallel",),
            vmem_limit_bytes=48 * 1024 * 1024,
        ),
    )(x2d,
      prepped["w1"], prepped["b1"], prepped["w2"], prepped["b2"],
      prepped["w3"], prepped["b3"], prepped["w4"], prepped["b4"])

    # Strip batch padding; unsqueeze(1). (No feature-lane slice needed.)
    return out[:B].reshape(B, 1, F)


def init_params(key, input_size, hidden_size=64):
    """Weights stored (in, out); biases (1, out). Uniform(-1/sqrt(in), +) like torch."""
    dims = [
        (input_size, hidden_size),        # encoder Linear 1
        (hidden_size, hidden_size // 2),  # encoder Linear 2
        (hidden_size // 2, hidden_size),  # decoder Linear 1
        (hidden_size, input_size),        # decoder Linear 2
    ]
    params = []
    for (fan_in, fan_out) in dims:
        key, kw, kb = jax.random.split(key, 3)
        bound = 1.0 / jnp.sqrt(fan_in)
        w = jax.random.uniform(kw, (fan_in, fan_out), jnp.float32, -bound, bound)
        b = jax.random.uniform(kb, (1, fan_out), jnp.float32, -bound, bound)
        params.append((w, b))
    return params


def _reference_forward_f32(x, params):
    """Plain-JAX f32 reference (mirrors the PyTorch forward exactly)."""
    (w1, b1), (w2, b2), (w3, b3), (w4, b4) = params
    h = x.reshape(x.shape[0], -1)
    h = jnp.maximum(h @ w1 + b1, 0.0)
    h = jnp.maximum(h @ w2 + b2, 0.0)
    h = jnp.maximum(h @ w3 + b3, 0.0)
    y = h @ w4 + b4
    return y[:, None, :]


def _reference_forward_bf16(x, params):
    """Plain-JAX reference with the same bf16-matmul / f32-elementwise recipe."""
    (w1, b1), (w2, b2), (w3, b3), (w4, b4) = params

    def layer(h, w, b, relu):
        h = jnp.dot(h.astype(jnp.bfloat16), w.astype(jnp.bfloat16),
                    preferred_element_type=jnp.float32) + b
        return jnp.maximum(h, 0.0) if relu else h

    h = x.reshape(x.shape[0], -1)
    h = layer(h, w1, b1, True)
    h = layer(h, w2, b2, True)
    h = layer(h, w3, b3, True)
    y = layer(h, w4, b4, False)
    return y[:, None, :].astype(x.dtype)


if __name__ == "__main__":
    key = jax.random.PRNGKey(0)
    B, input_size, hidden_size = 16, 32, 64

    key, kx = jax.random.split(key)
    x = jax.random.normal(kx, (B, 1, input_size), jnp.float32)
    params = init_params(key, input_size, hidden_size)
    prepped = prepare_params(params)          # pad/cast weights ONCE

    out = jax.block_until_ready(autoencoder_forward(x, prepped))
    assert out.shape == (B, 1, input_size)

    # Tight check vs a reference doing the identical bf16-matmul recipe.
    ref_bf16 = _reference_forward_bf16(x, params)
    assert jnp.allclose(out, ref_bf16, atol=2e-3, rtol=2e-3), "mismatch vs bf16 reference"

    # Loose sanity check vs the pure-f32 torch-equivalent reference.
    ref_f32 = _reference_forward_f32(x, params)
    assert jnp.allclose(out, ref_f32, atol=1e-1, rtol=1e-1), "mismatch vs f32 reference"

    # Also exercise the non-multiple-of-8 batch (tail padding) path.
    key, kx2 = jax.random.split(key)
    x_odd = jax.random.normal(kx2, (10, 1, input_size), jnp.float32)
    out_odd = jax.block_until_ready(autoencoder_forward(x_odd, prepped))
    assert out_odd.shape == (10, 1, input_size)
    assert jnp.allclose(out_odd, _reference_forward_bf16(x_odd, params),
                        atol=2e-3, rtol=2e-3), "mismatch on padded-batch path"

    print("KERNEL_OK")
</pallas_src>

<mosaic_0001>
module attributes {stable_mosaic.version = 11 : i64} {
  func.func @_autoencoder_kernel(%arg0: i32, %arg1: memref<8x32xf32, #tpu.memory_space<vmem>>, %arg2: memref<32x128xbf16, #tpu.memory_space<vmem>>, %arg3: memref<1x128xf32, #tpu.memory_space<vmem>>, %arg4: memref<128x128xbf16, #tpu.memory_space<vmem>>, %arg5: memref<1x128xf32, #tpu.memory_space<vmem>>, %arg6: memref<128x128xbf16, #tpu.memory_space<vmem>>, %arg7: memref<1x128xf32, #tpu.memory_space<vmem>>, %arg8: memref<128x32xbf16, #tpu.memory_space<vmem>>, %arg9: memref<1x32xf32, #tpu.memory_space<vmem>>, %arg10: memref<8x32xf32, #tpu.memory_space<vmem>>) attributes {dimension_semantics = [#tpu.dimension_semantics<parallel>], iteration_bounds = array<i64: 2>, scalar_prefetch = 0 : i64, scratch_operands = 0 : i64, tpu.core_type = #tpu.core_type<tc>, window_params = [{transform_indices = @transform_0, window_bounds = array<i64: 8, 32>}, {pipeline_mode = #tpu.pipeline_mode<synchronous>, transform_indices = @transform_1, window_bounds = array<i64: 32, 128>}, {pipeline_mode = #tpu.pipeline_mode<synchronous>, transform_indices = @transform_2, window_bounds = array<i64: 1, 128>}, {pipeline_mode = #tpu.pipeline_mode<synchronous>, transform_indices = @transform_3, window_bounds = array<i64: 128, 128>}, {pipeline_mode = #tpu.pipeline_mode<synchronous>, transform_indices = @transform_4, window_bounds = array<i64: 1, 128>}, {pipeline_mode = #tpu.pipeline_mode<synchronous>, transform_indices = @transform_5, window_bounds = array<i64: 128, 128>}, {pipeline_mode = #tpu.pipeline_mode<synchronous>, transform_indices = @transform_6, window_bounds = array<i64: 1, 128>}, {pipeline_mode = #tpu.pipeline_mode<synchronous>, transform_indices = @transform_7, window_bounds = array<i64: 128, 32>}, {pipeline_mode = #tpu.pipeline_mode<synchronous>, transform_indices = @transform_8, window_bounds = array<i64: 1, 32>}, {transform_indices = @transform_9, window_bounds = array<i64: 8, 32>}]} {
    %c0 = arith.constant 0 : index
    %c0_0 = arith.constant 0 : index
    %0 = vector.load %arg1[%c0, %c0_0] : memref<8x32xf32, #tpu.memory_space<vmem>>, vector<8x32xf32>
    %1 = arith.truncf %0 : vector<8x32xf32> to vector<8x32xbf16>
    %c0_1 = arith.constant 0 : index
    %c0_2 = arith.constant 0 : index
    %2 = vector.load %arg2[%c0_1, %c0_2] : memref<32x128xbf16, #tpu.memory_space<vmem>>, vector<32x128xbf16>
    %cst = arith.constant dense<0.000000e+00> : vector<8x128xf32>
    %3 = tpu.matmul %1, %2, %cst {dimension_numbers = #tpu.dot_dimension_numbers<[1], [0], [0], [1], [0, 0, 1, 1], [], []>} : vector<8x32xbf16>, vector<32x128xbf16>, vector<8x128xf32> -> vector<8x128xf32>
    %c0_3 = arith.constant 0 : index
    %c0_4 = arith.constant 0 : index
    %4 = vector.load %arg3[%c0_3, %c0_4] : memref<1x128xf32, #tpu.memory_space<vmem>>, vector<1x128xf32>
    %5 = vector.broadcast %4 : vector<1x128xf32> to vector<8x128xf32>
    %6 = arith.addf %3, %5 : vector<8x128xf32>
    %cst_5 = arith.constant 0.000000e+00 : f32
    %7 = vector.broadcast %cst_5 : f32 to vector<8x128xf32>
    %8 = arith.maximumf %6, %7 : vector<8x128xf32>
    %9 = arith.truncf %8 : vector<8x128xf32> to vector<8x128xbf16>
    %c0_6 = arith.constant 0 : index
    %c0_7 = arith.constant 0 : index
    %10 = vector.load %arg4[%c0_6, %c0_7] : memref<128x128xbf16, #tpu.memory_space<vmem>>, vector<128x128xbf16>
    %cst_8 = arith.constant dense<0.000000e+00> : vector<8x128xf32>
    %11 = tpu.matmul %9, %10, %cst_8 {dimension_numbers = #tpu.dot_dimension_numbers<[1], [0], [0], [1], [0, 0, 1, 1], [], []>} : vector<8x128xbf16>, vector<128x128xbf16>, vector<8x128xf32> -> vector<8x128xf32>
    %c0_9 = arith.constant 0 : index
    %c0_10 = arith.constant 0 : index
    %12 = vector.load %arg5[%c0_9, %c0_10] : memref<1x128xf32, #tpu.memory_space<vmem>>, vector<1x128xf32>
    %13 = vector.broadcast %12 : vector<1x128xf32> to vector<8x128xf32>
    %14 = arith.addf %11, %13 : vector<8x128xf32>
    %cst_11 = arith.constant 0.000000e+00 : f32
    %15 = vector.broadcast %cst_11 : f32 to vector<8x128xf32>
    %16 = arith.maximumf %14, %15 : vector<8x128xf32>
    %17 = arith.truncf %16 : vector<8x128xf32> to vector<8x128xbf16>
    %c0_12 = arith.constant 0 : index
    %c0_13 = arith.constant 0 : index
    %18 = vector.load %arg6[%c0_12, %c0_13] : memref<128x128xbf16, #tpu.memory_space<vmem>>, vector<128x128xbf16>
    %cst_14 = arith.constant dense<0.000000e+00> : vector<8x128xf32>
    %19 = tpu.matmul %17, %18, %cst_14 {dimension_numbers = #tpu.dot_dimension_numbers<[1], [0], [0], [1], [0, 0, 1, 1], [], []>} : vector<8x128xbf16>, vector<128x128xbf16>, vector<8x128xf32> -> vector<8x128xf32>
    %c0_15 = arith.constant 0 : index
    %c0_16 = arith.constant 0 : index
    %20 = vector.load %arg7[%c0_15, %c0_16] : memref<1x128xf32, #tpu.memory_space<vmem>>, vector<1x128xf32>
    %21 = vector.broadcast %20 : vector<1x128xf32> to vector<8x128xf32>
    %22 = arith.addf %19, %21 : vector<8x128xf32>
    %cst_17 = arith.constant 0.000000e+00 : f32
    %23 = vector.broadcast %cst_17 : f32 to vector<8x128xf32>
    %24 = arith.maximumf %22, %23 : vector<8x128xf32>
    %25 = arith.truncf %24 : vector<8x128xf32> to vector<8x128xbf16>
    %c0_18 = arith.constant 0 : index
    %c0_19 = arith.constant 0 : index
    %26 = vector.load %arg8[%c0_18, %c0_19] : memref<128x32xbf16, #tpu.memory_space<vmem>>, vector<128x32xbf16>
    %cst_20 = arith.constant dense<0.000000e+00> : vector<8x32xf32>
    %27 = tpu.matmul %25, %26, %cst_20 {dimension_numbers = #tpu.dot_dimension_numbers<[1], [0], [0], [1], [0, 0, 1, 1], [], []>} : vector<8x128xbf16>, vector<128x32xbf16>, vector<8x32xf32> -> vector<8x32xf32>
    %c0_21 = arith.constant 0 : index
    %c0_22 = arith.constant 0 : index
    %28 = vector.load %arg9[%c0_21, %c0_22] : memref<1x32xf32, #tpu.memory_space<vmem>>, vector<1x32xf32>
    %29 = vector.broadcast %28 : vector<1x32xf32> to vector<8x32xf32>
    %30 = arith.addf %27, %29 : vector<8x32xf32>
    %c0_23 = arith.constant 0 : index
    %c0_24 = arith.constant 0 : index
    %31 = vector.load %arg10[%c0_23, %c0_24] : memref<8x32xf32, #tpu.memory_space<vmem>>, vector<8x32xf32>
    tpu.vector_store %arg10[%c0_23, %c0_24], %30 {strides = array<i32>} : memref<8x32xf32, #tpu.memory_space<vmem>>, vector<8x32xf32>,
    return
  }
  func.func @transform_0(%arg0: i32) -> (i32, i32) {
    %c0_i32 = arith.constant 0 : i32
    %c0_i32_0 = arith.constant 0 : i32
    return %arg0, %c0_i32 : i32, i32
  }
  func.func @transform_1(%arg0: i32) -> (i32, i32) {
    %c0_i32 = arith.constant 0 : i32
    %c0_i32_0 = arith.constant 0 : i32
    %c0_i32_1 = arith.constant 0 : i32
    return %c0_i32, %c0_i32_0 : i32, i32
  }
  func.func @transform_2(%arg0: i32) -> (i32, i32) {
    %c0_i32 = arith.constant 0 : i32
    %c0_i32_0 = arith.constant 0 : i32
    %c0_i32_1 = arith.constant 0 : i32
    return %c0_i32, %c0_i32_0 : i32, i32
  }
  func.func @transform_3(%arg0: i32) -> (i32, i32) {
    %c0_i32 = arith.constant 0 : i32
    %c0_i32_0 = arith.constant 0 : i32
    %c0_i32_1 = arith.constant 0 : i32
    return %c0_i32, %c0_i32_0 : i32, i32
  }
  func.func @transform_4(%arg0: i32) -> (i32, i32) {
    %c0_i32 = arith.constant 0 : i32
    %c0_i32_0 = arith.constant 0 : i32
    %c0_i32_1 = arith.constant 0 : i32
    return %c0_i32, %c0_i32_0 : i32, i32
  }
  func.func @transform_5(%arg0: i32) -> (i32, i32) {
    %c0_i32 = arith.constant 0 : i32
    %c0_i32_0 = arith.constant 0 : i32
    %c0_i32_1 = arith.constant 0 : i32
    return %c0_i32, %c0_i32_0 : i32, i32
  }
  func.func @transform_6(%arg0: i32) -> (i32, i32) {
    %c0_i32 = arith.constant 0 : i32
    %c0_i32_0 = arith.constant 0 : i32
    %c0_i32_1 = arith.constant 0 : i32
    return %c0_i32, %c0_i32_0 : i32, i32
  }
  func.func @transform_7(%arg0: i32) -> (i32, i32) {
    %c0_i32 = arith.constant 0 : i32
    %c0_i32_0 = arith.constant 0 : i32
    %c0_i32_1 = arith.constant 0 : i32
    return %c0_i32, %c0_i32_0 : i32, i32
  }
  func.func @transform_8(%arg0: i32) -> (i32, i32) {
    %c0_i32 = arith.constant 0 : i32
    %c0_i32_0 = arith.constant 0 : i32
    %c0_i32_1 = arith.constant 0 : i32
    return %c0_i32, %c0_i32_0 : i32, i32
  }
  func.func @transform_9(%arg0: i32) -> (i32, i32) {
    %c0_i32 = arith.constant 0 : i32
    %c0_i32_0 = arith.constant 0 : i32
    return %arg0, %c0_i32 : i32, i32
  }
}

</mosaic_0001>

<bundles_post_ra>
// kernel: tpu_custom_call.1
= control target key start
LH: loop header
LB: loop body
LE: loop exit
PB: predicated region body
PF: predicated region fallthrough
CT: control target
= control target key end

     0   :  { %s1318_s0 = inlined_call_operand.vmem [shape: f32[16,32], index: 0, kind: input, shape index: {}]   ;;  %s1319_s1 = inlined_call_operand.hbm [shape: bf16[32,128], index: 1, kind: input, shape index: {}]   ;;  %s1320_s2 = inlined_call_operand.vmem [shape: f32[1,128], index: 2, kind: input, shape index: {}]   ;;  %s1321_s3 = inlined_call_operand.vmem [shape: bf16[128,128], index: 3, kind: input, shape index: {}]   ;;  %s1322_s4 = inlined_call_operand.vmem [shape: f32[1,128], index: 4, kind: input, shape index: {}]   ;;  %s1323_s5 = inlined_call_operand.hbm [shape: bf16[128,128], index: 5, kind: input, shape index: {}]   ;;  %s1324_s6 = inlined_call_operand.vmem [shape: f32[1,128], index: 6, kind: input, shape index: {}]   ;;  %s1325_s7 = inlined_call_operand.vmem [shape: bf16[128,32], index: 7, kind: input, shape index: {}]   ;;  %s1326_s8 = inlined_call_operand.vmem [shape: f32[1,32], index: 8, kind: input, shape index: {}]   ;;  %s1327_s9 = inlined_call_operand.hbm [shape: f32[16,32], index: 9, kind: output, shape index: {}]  }
   0x1   :  { %1328 = sst [smem:[#allocation11_spill]] %s1318_s0 }
   0x2   :  { %14 = vsyncpa [#allocation3], 0 }
   0x3   :  { %15 = vsyncpa [#allocation6], 0 }
   0x4   :  { %16 = vsyncpa [#allocation4], 0 }
   0x5   :  { %18 = vsyncpa [#allocation4 + $0x1], 0  ;;  %s1146_s30 = smov 0   ;;  %s1148_s10 = smov 0  }
   0x6   :  { %s1150_s11 = smov 0   ;;  %s1152_s12 = smov 0  }
   0x7 LB: > { %s1167_s13 = sadd.s32 4294967295, %s1090_s12   ;;  %s749_s14 = sadd.s32 4294967294, %s1090_s12   ;;  %s1090_s12 = sphi %s1152_s12, %s1336_s12   ;;  %s1086_s11 = sphi %s1150_s11, %s1335_s11   ;;  %s1082_s10 = sphi %s1148_s10, %s1334_s10   ;;  %s1078_s30 = sphi %s1146_s30, %s1333_s30  }
   0x8   : > { %s1171_s15 = sadd.s32 1, %s1090_s12   ;;  %s225_s16 = sadd.s32 1, %s1086_s11 }
   0x9   : > { %s222_s17 = ssub.s32 %s1090_s12, %s1171_s15  ;;  %p235_p0 = scmp.ne.s32.totalorder %s1086_s11, %s1082_s10 }
   0xa   : > { %p223_p1 = scmp.eq.s32.totalorder %s222_s17, 0  ;;  %p236_p2 = scmp.eq.s32.totalorder %s1167_s13, 1 }
   0xb   : > { %p241_p3 = scmp.ne.s32.totalorder %s1082_s10, %s1078_s30  ;;  %p242_p4 = scmp.eq.s32.totalorder %s749_s14, 1 }
   0xc   : > { %s1182_s18 = scalar_select %p223_p1, %s1086_s11, %s225_s16  }
   0xd   : > { %p1184_p5 = por %p236_p2, %p235_p0  ;;  %p1188_p6 = por %p242_p4, %p241_p3 }
   0xe   : > { %p750_p7 = scmp.ge.s32.totalorder %s1090_s12, 1  ;;  %p249_p8 = scmp.lt.s32.totalorder %s1090_s12, 3 }
   0xf   : > { %p915_p9 = scmp.eq.s32.totalorder %s1167_s13, 0  ;;  %s260_s24 = sshll.u32 %s1319_s1, 4  ;;  %s261_s24 = int_to_ptr.hbm [resolvable:$true] %s260_s24 }
  0x10   : > { %p1195_p10 = pnand %p750_p7, %p249_p8  ;;  %s1092_s25 = smov [#allocation2]  }
  0x11   : > { %s262_s26 = sshll.u32 %s1092_s25, 4  ;;  %s283_s29 = sshll.u32 %s1323_s5, 4  ;;  %s263_s26 = int_to_ptr.vmem [resolvable:$true] %s262_s26  ;;  %s284_s29 = int_to_ptr.hbm [resolvable:$true] %s283_s29 }
  0x12   : > { %p904_p11 = pneg %p1195_p10  ;;  %s1093_s14 = smov 64  }
  0x13   : > { %s1094_s16 = smov 4   ;;  %s1095_s17 = smov [#allocation5]  }
  0x14   : > { %p905_p12 = pnand %p915_p9, %p904_p11  ;;  %s285_s22 = sshll.u32 %s1095_s17, 4  ;;  %s286_s22 = int_to_ptr.vmem [resolvable:$true] %s285_s22 }
  0x15   : > { %317 = sbr.rel (%p1195_p10) target bundleno = 581 (0x245), region = 56 }
  0x16   : > { %907 = dma.hbm_to_vmem [thread:$0]  (!%p905_p12), %s261_s24, 256, %s263_s26, [#allocation3], %s1093_s14, %s1093_s14, %s1094_s16  }
  0x17   : > { %910 = dma.hbm_to_vmem [thread:$0]  (!%p905_p12), %s284_s29, 1024, %s286_s22, [#allocation6], %s1093_s14, %s1093_s14, %s1094_s16  }
  0x1a   : > { %1065 = dma.done.wait (%p915_p9), [#allocation3], 256  }
  0x1b   : > { %1067 = vsyncadd (%p915_p9), [#allocation3], 4294967040 }
  0x1c   : > { %1069 = dma.done.wait (%p915_p9), [#allocation6], 1024  }
  0x1d   : > { %1071 = vsyncadd (%p915_p9), [#allocation6], 4294966272  ;;  %p358_p13 = scmp.lt.s32.totalorder %s1167_s13, 1  ;;  %s1332_s0 = sld [smem:[#allocation11_spill]]  ;;  %v869_v0 = vld [vmem:[#allocation2 + $0x8] sm:$0xff]  ;;  %v877_v1 = vld [vmem:[%s1321_s3 + $0x38] sm:$0xff] }
  0x1e   : > { %395 = vmatpush.bf16.msra.mxu0 %v869_v0  ;;  %v868_v2 = vld [vmem:[#allocation2] sm:$0xff]  ;;  %472 = vmatpush.bf16.msra.mxu1 %v877_v1  ;;  %v876_v4 = vld [vmem:[%s1321_s3 + $0x30] sm:$0xff]  ;;  %vm385_vm0 = vcmask 261120   ;;  %v875_v6 = vld [vmem:[%s1321_s3 + $0x28] sm:$0xff]  ;;  %s355_s29 = sand.u32 1, %s1082_s10   ;;  %s865_s14 = sshll.u32 %s1167_s13, 3 }
  0x1f   : > { %s359_s23 = scalar_select %p358_p13, %s1167_s13, 1  ;;  %v874_v7 = vld [vmem:[%s1321_s3 + $0x20] sm:$0xff]  ;;  %v873_v8 = vld [vmem:[%s1321_s3 + $0x18] sm:$0xff]  ;;  %v872_v9 = vld [vmem:[%s1321_s3 + $0x10] sm:$0xff] }
  0x20   : > { %v871_v10 = vld [vmem:[%s1321_s3 + $0x8] sm:$0xff]  ;;  %v870_v11 = vld [vmem:[%s1321_s3] sm:$0xff]  ;;  %v883_v14 = vld [vmem:[#allocation5 + $0x28] sm:$0xff]  ;;  %s757_s16 = sshll.u32 %s355_s29, 3  ;;  %s653_s13 = scalar_lea.sflag [#allocation4], %s355_s29 }
  0x21   : > { %s758_s24 = sshll.u32 %s359_s23, 3  ;;  %v885_v12 = vld [vmem:[#allocation5 + $0x38] sm:$0xff]  ;;  %v884_v13 = vld [vmem:[#allocation5 + $0x30] sm:$0xff]  ;;  %v882_v15 = vld [vmem:[#allocation5 + $0x20] sm:$0xff]  ;;  %s663_s23 = scalar_lea.hbm %s1327_s9, %s865_s14 }
  0x22   : > { %396 = vmatpush.bf16.msra.mxu0 %v868_v2  ;;  %473 = vmatpush.bf16.msra.mxu1 %v876_v4  ;;  %v881_v16 = vld [vmem:[#allocation5 + $0x18] sm:$0xff]  ;;  %v880_v17 = vld [vmem:[#allocation5 + $0x10] sm:$0xff]  ;;  %v879_v24 = vld [vmem:[#allocation5 + $0x8] sm:$0xff]  ;;  %s357_s21 = scalar_lea.vmem [#allocation7], %s757_s16  ;;  %s667_s27 = sshll.u32 %s663_s23, 4  ;;  %s668_s27 = int_to_ptr.hbm [resolvable:$true] %s667_s27 }
  0x23   : > { %s361_s26 = scalar_lea.vmem %s1332_s0, %s758_s24  ;;  %555 = vmatpush.bf16.msra.mxu2 %v885_v12  ;;  %v956_v18 = vld [vmem:[%s1320_s2] ss:$0 sm:$0xff]  ;;  %v878_v25 = vld [vmem:[#allocation5] sm:$0xff]  ;;  %v893_v26 = vld [vmem:[%s1325_s7 + $0x38] sm:$0xff]  ;;  %s1034_s28 = sshra.s32 %s668_s27, 4  ;;  %s1035_s28 = int_to_ptr.hbm [resolvable:$true] %s1034_s28 }
  0x24   : > { %v363_v3 = vld [vmem:[%s361_s26] sm:$0xff]  ;;  %638 = vmatpush.bf16.msra.mxu3 %v893_v26  ;;  %v892_v27 = vld [vmem:[%s1325_s7 + $0x30] sm:$0xff]  ;;  %v891_v28 = vld [vmem:[%s1325_s7 + $0x28] sm:$0xff]  ;;  %s665_s26 = sshll.u32 %s357_s21, 4  ;;  %s1036_s0 = scalar_lea.hbm %s1035_s28, 8  ;;  %s666_s26 = int_to_ptr.vmem [resolvable:$true] %s665_s26 }
  0x25   : > { %v364_v5 = vpack.c.bf16 %v363_v3, %v363_v3  ;;  %v890_v29 = vld [vmem:[%s1325_s7 + $0x20] sm:$0xff]  ;;  %v889_v30 = vld [vmem:[%s1325_s7 + $0x18] sm:$0xff]  ;;  %v888_v31 = vld [vmem:[%s1325_s7 + $0x10] sm:$0xff]  ;;  %p1037_p0 = scmp.ne.s32.totalorder %s1035_s28, %s1036_s0  ;;  %s1040_s16 = scalar_lea.hbm %s1327_s9, 16 }
  0x26   : > { %474 = vmatpush.bf16.msra.mxu1 %v875_v6  ;;  %v957_v32 = vld [vmem:[%s1322_s4] ss:$0 sm:$0xff]  ;;  %v887_v38 = vld [vmem:[%s1325_s7 + $0x8] sm:$0xff]  ;;  %p1041_p3 = scmp.lt.s32.totalorder %s1035_s28, %s1327_s9  ;;  %p1042_p4 = scmp.lt.s32.totalorder %s1040_s16, %s1036_s0 }
  0x27   : > { %767 = vmatmul.msk.bf16.vlgmr.msra.gmra.mxu0 %vm385_vm0, %v364_v5  ;;  %556 = vmatpush.bf16.msra.mxu2 %v884_v13  ;;  %v886_v39 = vld [vmem:[%s1325_s7] sm:$0xff]  ;;  %p1038_p1 = pnand %p1037_p0, %p1184_p5 }
  0x28   : > { %639 = vmatpush.bf16.msra.mxu3 %v892_v27  ;;  %v958_v40 = vld [vmem:[%s1324_s6] ss:$0 sm:$0xff]  ;;  %p1043_p7 = por %p1042_p4, %p1041_p3 }
  0x29   : > { %v959_v46 = vld [vmem:[%s1326_s8] ss:$0 sm:$0xff]  ;;  %p1039_p2 = pneg %p1038_p1 }
  0x2a   : > { %475 = vmatpush.bf16.msra.mxu1 %v874_v7 }
  0x2b   : > { %557 = vmatpush.bf16.msra.mxu2 %v883_v14  ;;  %p1044_p8 = pnand %p1043_p7, %p1039_p2 }
  0x2c   : > { %640 = vmatpush.bf16.msra.mxu3 %v891_v28 }
  0x2e   : > { %476 = vmatpush.bf16.msra.mxu1 %v873_v8 }
  0x2f   : > { %558 = vmatpush.bf16.msra.mxu2 %v882_v15 }
  0x30   : > { %641 = vmatpush.bf16.msra.mxu3 %v890_v29 }
  0x32   : > { %477 = vmatpush.bf16.msra.mxu1 %v872_v9 }
  0x33   : > { %559 = vmatpush.bf16.msra.mxu2 %v881_v16 }
  0x34   : > { %642 = vmatpush.bf16.msra.mxu3 %v889_v30 }
  0x36   : > { %478 = vmatpush.bf16.msra.mxu1 %v871_v10 }
  0x37   : > { %560 = vmatpush.bf16.msra.mxu2 %v880_v17 }
  0x38   : > { %643 = vmatpush.bf16.msra.mxu3 %v888_v31 }
  0x3a   : > { %479 = vmatpush.bf16.msra.mxu1 %v870_v11 }
  0x3b   : > { %561 = vmatpush.bf16.msra.mxu2 %v879_v24 }
  0x3c   : > { %644 = vmatpush.bf16.msra.mxu3 %v887_v38 }
  0x3f   : > { %562 = vmatpush.bf16.msra.mxu2 %v878_v25 }
  0x40   : > { %645 = vmatpush.bf16.msra.mxu3 %v886_v39 }
  0xa4   : > { %v398_v19 = vpop.f32.mrf.mxu0 }
  0xa5   : > { %v399_v20 = vadd.f32 %v956_v18, %v398_v19 }
  0xa7   : > { %v402_v21 = vmax.f32 %v399_v20, 0.0 }
  0xa9   : > { %v403_v22 = vpack.c.bf16 %v402_v21, %v402_v21 }
  0xab   : > { %480 = vmatmul.bf16.vlgmr.msra.gmra.mxu1 %v403_v22 }
  0xac   : > { %v400_v23 = vpop.f32.mrf.mxu0 }
 0x128   : > { %v481_v33 = vpop.f32.mrf.mxu1 }
 0x129   : > { %v482_v34 = vadd.f32 %v957_v32, %v481_v33 }
 0x12b   : > { %v485_v35 = vmax.f32 %v482_v34, 0.0 }
 0x12d   : > { %v486_v36 = vpack.c.bf16 %v485_v35, %v485_v35 }
 0x12f   : > { %563 = vmatmul.bf16.vlgmr.msra.gmra.mxu2 %v486_v36 }
 0x130   : > { %v483_v37 = vpop.f32.mrf.mxu1 }
 0x1b2   : > { %v564_v41 = vpop.f32.mrf.mxu2 }
 0x1b3   : > { %v565_v42 = vadd.f32 %v958_v40, %v564_v41 }
 0x1b5   : > { %v568_v43 = vmax.f32 %v565_v42, 0.0 }
 0x1b7   : > { %v569_v44 = vpack.c.bf16 %v568_v43, %v568_v43 }
 0x1b9   : > { %646 = vmatmul.bf16.vlgmr.msra.gmra.mxu3 %v569_v44 }
 0x1ba   : > { %v566_v45 = vpop.f32.mrf.mxu2 }
 0x23c   : > { %v647_v47 = vpop.f32.mrf.mxu3 }
 0x23d   : > { %v648_v48 = vadd.f32 %v959_v46, %v647_v47 }
 0x23f   : > { %651 = vst.msk [vmem:[%s357_s21] sm:$0xff] %vm385_vm0, %v648_v48 }
 0x240   : > { %1047 = shalt.err (!%p1044_p8)
}
 0x241   : > { %902 = dma.vmem_to_hbm [thread:$0]  (%p1184_p5), %s666_s26, 128, %s668_s27, %s653_s13  }
 0x244   : > { %v649_v49 = vpop.f32.mrf.mxu3 }
 0x245 PF: > { %p919_p9 = scmp.ge.s32.totalorder %s1090_s12, 2  ;;  %s679_s29 = sand.u32 1, %s1078_s30  }
 0x246   : > { %s680_s24 = scalar_lea.sflag [#allocation4], %s679_s29 }
 0x247   : > { %p912_p10 = pnand %p919_p9, %p1188_p6 }
 0x249   : > { %p913_p11 = pneg %p912_p10 }
 0x24b   : > { %1073 = dma.done.wait (%p913_p11), %s680_s24, 128  }
 0x24c   : > { %1075 = vsyncadd (%p913_p11), %s680_s24, 4294967168  ;;  %p21_p12 = scmp.ge.s32.totalorder %s1171_s15, 4   ;;  %s1333_s30 = smov %s1082_s10 }
 0x24d   : > { %s1334_s10 = smov %s1086_s11  ;;  %s1335_s11 = smov %s1182_s18 }
 0x24e   : > { %s1336_s12 = smov %s1171_s15  ;;  %23 = sbr.rel (!%p21_p12) target bundleno = 7 (0x7), region = 100 }
 0x253   :  { %686 = vsyncpa [#allocation3], 1 }
 0x254   :  { %688 = vsyncpa [#allocation3 + $0x1], 1 }
 0x255   :  { %689 = vsyncpa [#allocation6], 1 }
 0x256   :  { %690 = vsyncpa [#allocation4], 1 }
 0x257   :  { %692 = vsyncpa [#allocation4 + $0x1], 1 }

</bundles_post_ra>
